<compile_context>
chip_gen: v6e
topology: v6e:2x2x1
jax: 0.10.0
libtpu: 0.0.40
codegen_flags: <defaults>
</compile_context>

<pallas_src>
import functools

import jax
import jax.numpy as jnp
from jax import lax
from jax.experimental import pallas as pl
from jax.experimental.pallas import tpu as pltpu

_LANES = 128
_CHUNK_ROWS = 1024             # rows per inner reduction chunk (~512 KiB f32 temps)
_TARGET_BLOCK_BYTES = 4 << 20  # ~4 MiB per input per grid step
_ACC_ROWS_MAX = 64             # widened vreg-shaped accumulator (8 vregs)
_VMEM_LIMIT_BYTES = 32 << 20   # 2 inputs x 2 bufs x 4 MiB + temps, safe on all gens


def _round_up(x, m):
    return ((x + m - 1) // m) * m


def _sublane_pack(dtype):
    # f32 -> 8, bf16 -> 16, int8/fp8 -> 32 rows per packed sublane tile.
    return max(8, 32 // jnp.dtype(dtype).itemsize)


def _pick_acc_rows(chunk_rows):
    for cand in (_ACC_ROWS_MAX, 32, 16, 8):
        if chunk_rows % cand == 0:
            return cand
    return chunk_rows


def _rmse_sse_kernel(yhat_ref, y_ref, out_ref, acc_ref, *, tile_rows, chunk_rows,
                     acc_rows, steps_per_split, valid_rows, first_masked_block,
                     needs_mask):
    """Streaming SSE reduction; each split emits its partial SSE on its last step."""
    c = pl.program_id(0)                      # split index (parallel axis)
    i = pl.program_id(1)                      # step within split (arbitrary axis)
    block = c * steps_per_split + i           # logical (unclamped) row-block index
    n_chunks = tile_rows // chunk_rows

    @pl.when(i == 0)
    def _():
        acc_ref[...] = jnp.zeros_like(acc_ref)

    def chunk_body(start, masked):
        yh = yhat_ref[pl.ds(start, chunk_rows), :].astype(jnp.float32)
        yy = y_ref[pl.ds(start, chunk_rows), :].astype(jnp.float32)
        d = yh - yy
        sq = d * d
        if masked:
            # Zero the contribution of rows past `valid_rows` (partial last
            # block and/or the clamped duplicate block when splitting oddly).
            row_ids = (block * tile_rows + start
                       + lax.broadcasted_iota(jnp.int32, (chunk_rows, _LANES), 0))
            sq = jnp.where(row_ids < valid_rows, sq, 0.0)
        # Fold into a wide vreg-shaped partial accumulator (pure VPU adds).
        acc_ref[...] += jnp.sum(sq.reshape(-1, acc_rows, _LANES), axis=0)

    def accumulate(masked):
        if n_chunks == 1:
            chunk_body(0, masked)
        else:
            def body(ch, carry):
                start = pl.multiple_of(ch * chunk_rows, chunk_rows)
                chunk_body(start, masked)
                return carry
            lax.fori_loop(0, n_chunks, body, 0, unroll=True)

    if needs_mask:
        # Only the final logical block(s) need masking; keep the mask work off
        # the steady-state hot path.
        @pl.when(block < first_masked_block)
        def _():
            accumulate(False)

        @pl.when(block >= first_masked_block)
        def _():
            accumulate(True)
    else:
        accumulate(False)

    @pl.when(i == pl.num_programs(1) - 1)
    def _():
        # Single cross-lane/sublane reduce per split.
        out_ref[...] = jnp.sum(acc_ref[...]).reshape(1, 1, 1)


def rmse_loss(yhat, y):
    assert yhat.shape == y.shape, "yhat and y must have the same shape"
    total_count = yhat.size

    yhat_flat = jnp.ravel(yhat)
    y_flat = jnp.ravel(y)

    main = (total_count // _LANES) * _LANES
    rows = main // _LANES

    # <128-element tail handled in plain JAX (avoids padded copies of the
    # full inputs in HBM).
    if main < total_count:
        dt = (yhat_flat[main:].astype(jnp.float32)
              - y_flat[main:].astype(jnp.float32))
        tail_sse = jnp.sum(dt * dt)
    else:
        tail_sse = jnp.float32(0.0)

    if rows == 0:
        sse = tail_sse
    else:
        pack = max(_sublane_pack(yhat.dtype), _sublane_pack(y.dtype))
        itemsize = max(jnp.dtype(yhat.dtype).itemsize, jnp.dtype(y.dtype).itemsize)
        max_tile_rows = max(_TARGET_BLOCK_BYTES // (_LANES * itemsize), pack)
        tile_rows = min(max_tile_rows, _round_up(rows, pack))
        chunk_rows = _CHUNK_ROWS if tile_rows % _CHUNK_ROWS == 0 else tile_rows
        acc_rows = _pick_acc_rows(chunk_rows)

        steps_total = pl.cdiv(rows, tile_rows)
        # 2-way split across a leading "parallel" axis: each v7x TensorCore
        # streams half the rows; neutral on single-core v5e/v6e.
        n_splits = 2 if steps_total >= 2 else 1
        steps_per_split = pl.cdiv(steps_total, n_splits)
        padded_blocks = n_splits * steps_per_split
        partial_last = (rows % tile_rows) != 0
        needs_mask = partial_last or (padded_blocks > steps_total)
        first_masked_block = steps_total - 1 if partial_last else steps_total

        def in_index_map(c, i):
            b = c * steps_per_split + i
            if padded_blocks > steps_total:
                # Clamp the single padded duplicate block so its DMA stays in
                # bounds; its contribution is zeroed by the in-kernel mask.
                b = jnp.minimum(b, steps_total - 1)
            return (b, 0)

        # No padding: pure views when total_count % 128 == 0, otherwise only
        # the 128-aligned prefix is sliced.
        yhat2d = yhat_flat[:main].reshape(rows, _LANES)
        y2d = y_flat[:main].reshape(rows, _LANES)

        partials = pl.pallas_call(
            functools.partial(
                _rmse_sse_kernel,
                tile_rows=tile_rows, chunk_rows=chunk_rows, acc_rows=acc_rows,
                steps_per_split=steps_per_split, valid_rows=rows,
                first_masked_block=first_masked_block, needs_mask=needs_mask),
            out_shape=jax.ShapeDtypeStruct((n_splits, 1, 1), jnp.float32),
            grid_spec=pltpu.PrefetchScalarGridSpec(
                num_scalar_prefetch=0,
                grid=(n_splits, steps_per_split),
                in_specs=[
                    pl.BlockSpec((tile_rows, _LANES), in_index_map),
                    pl.BlockSpec((tile_rows, _LANES), in_index_map),
                ],
                out_specs=pl.BlockSpec((1, 1, 1), lambda c, i: (c, 0, 0)),
                scratch_shapes=[pltpu.VMEM((acc_rows, _LANES), jnp.float32)],
            ),
            compiler_params=pltpu.CompilerParams(
                dimension_semantics=("parallel", "arbitrary"),
                vmem_limit_bytes=_VMEM_LIMIT_BYTES,
            ),
        )(yhat2d, y2d)
        sse = jnp.sum(partials) + tail_sse

    return jnp.sqrt(sse / jnp.float32(total_count))


if __name__ == "__main__":
    key = jax.random.PRNGKey(0)
    k1, k2 = jax.random.split(key)
    # Small shapes consistent with a generic regression target (NCHW example).
    yhat = jax.random.normal(k1, (2, 4, 16, 16), dtype=jnp.float32)
    y = jax.random.normal(k2, (2, 4, 16, 16), dtype=jnp.float32)

    loss = jax.block_until_ready(rmse_loss(yhat, y))

    # Pure-JAX reference check.
    ref = jnp.sqrt(jnp.mean((yhat - y) ** 2))
    assert jnp.allclose(loss, ref, rtol=1e-5, atol=1e-6), (loss, ref)

    print("KERNEL_OK")
</pallas_src>

<mosaic_0001>
module attributes {stable_mosaic.version = 11 : i64} {
  func.func @_rmse_sse_kernel(%arg0: i32, %arg1: i32, %arg2: memref<16x128xf32, #tpu.memory_space<vmem>>, %arg3: memref<16x128xf32, #tpu.memory_space<vmem>>, %arg4: memref<1x1x1xf32, #tpu.memory_space<vmem>>, %arg5: memref<16x128xf32, #tpu.memory_space<vmem>>) attributes {dimension_semantics = [#tpu.dimension_semantics<parallel>, #tpu.dimension_semantics<arbitrary>], iteration_bounds = array<i64: 1, 1>, scalar_prefetch = 0 : i64, scratch_operands = 1 : i64, tpu.core_type = #tpu.core_type<tc>, window_params = [{transform_indices = @transform_0, window_bounds = array<i64: 16, 128>}, {transform_indices = @transform_1, window_bounds = array<i64: 16, 128>}, {transform_indices = @transform_2, window_bounds = array<i64: 1, 1, 1>}]} {
    %c0_i32 = arith.constant 0 : i32
    %0 = arith.cmpi eq, %arg1, %c0_i32 : i32
    %1 = arith.extui %0 : i1 to i32
    %c0_i32_0 = arith.constant 0 : i32
    %2 = arith.cmpi ne, %1, %c0_i32_0 : i32
    scf.if %2 {
      %cst_10 = arith.constant 0.000000e+00 : f32
      %15 = vector.broadcast %cst_10 : f32 to vector<16x128xf32>
      %c0_11 = arith.constant 0 : index
      %c0_12 = arith.constant 0 : index
      %16 = vector.load %arg5[%c0_11, %c0_12] : memref<16x128xf32, #tpu.memory_space<vmem>>, vector<16x128xf32>
      tpu.vector_store %arg5[%c0_11, %c0_12], %15 {strides = array<i32>} : memref<16x128xf32, #tpu.memory_space<vmem>>, vector<16x128xf32>,
    } else {
    }
    %c0 = arith.constant 0 : index
    %c0_1 = arith.constant 0 : index
    %3 = vector.load %arg2[%c0, %c0_1] : memref<16x128xf32, #tpu.memory_space<vmem>>, vector<16x128xf32>
    %c0_2 = arith.constant 0 : index
    %c0_3 = arith.constant 0 : index
    %4 = vector.load %arg3[%c0_2, %c0_3] : memref<16x128xf32, #tpu.memory_space<vmem>>, vector<16x128xf32>
    %5 = arith.subf %3, %4 : vector<16x128xf32>
    %6 = arith.mulf %5, %5 : vector<16x128xf32>
    %c0_4 = arith.constant 0 : index
    %c0_5 = arith.constant 0 : index
    %7 = vector.load %arg5[%c0_4, %c0_5] : memref<16x128xf32, #tpu.memory_space<vmem>>, vector<16x128xf32>
    %8 = vector.shape_cast %6 : vector<16x128xf32> to vector<1x16x128xf32>
    %cst = arith.constant dense<0.000000e+00> : vector<16x128xf32>
    %9 = vector.multi_reduction <add>, %8, %cst [0] : vector<1x16x128xf32> to vector<16x128xf32>
    %10 = arith.addf %7, %9 : vector<16x128xf32>
    %c0_6 = arith.constant 0 : index
    %c0_7 = arith.constant 0 : index
    %11 = vector.load %arg5[%c0_6, %c0_7] : memref<16x128xf32, #tpu.memory_space<vmem>>, vector<16x128xf32>
    tpu.vector_store %arg5[%c0_6, %c0_7], %10 {strides = array<i32>} : memref<16x128xf32, #tpu.memory_space<vmem>>, vector<16x128xf32>,
    %c0_i32_8 = arith.constant 0 : i32
    %12 = arith.cmpi eq, %arg1, %c0_i32_8 : i32
    %13 = arith.extui %12 : i1 to i32
    %c0_i32_9 = arith.constant 0 : i32
    %14 = arith.cmpi ne, %13, %c0_i32_9 : i32
    scf.if %14 {
      %c0_10 = arith.constant 0 : index
      %c0_11 = arith.constant 0 : index
      %15 = vector.load %arg5[%c0_10, %c0_11] : memref<16x128xf32, #tpu.memory_space<vmem>>, vector<16x128xf32>
      %16 = vector.shape_cast %15 : vector<16x128xf32> to vector<1x16x128xf32>
      %cst_12 = arith.constant dense<0.000000e+00> : vector<1xf32>
      %17 = vector.multi_reduction <add>, %16, %cst_12 [1, 2] : vector<1x16x128xf32> to vector<1xf32>
      %18 = vector.shape_cast %17 : vector<1xf32> to vector<1x1x1xf32>
      %19 = vector.extract %18[0, 0, 0] : f32 from vector<1x1x1xf32>
      %20 = vector.broadcast %19 : f32 to vector<1x1x1xf32>
      %c0_13 = arith.constant 0 : index
      %c0_14 = arith.constant 0 : index
      %c0_15 = arith.constant 0 : index
      %21 = vector.load %arg4[%c0_13, %c0_14, %c0_15] : memref<1x1x1xf32, #tpu.memory_space<vmem>>, vector<1x1x1xf32>
      tpu.vector_store %arg4[%c0_13, %c0_14, %c0_15], %20 {strides = array<i32>} : memref<1x1x1xf32, #tpu.memory_space<vmem>>, vector<1x1x1xf32>,
    } else {
    }
    return
  }
  func.func @transform_0(%arg0: i32, %arg1: i32) -> (i32, i32) {
    %c1_i32 = arith.constant 1 : i32
    %0 = arith.muli %arg0, %c1_i32 : i32
    %1 = arith.addi %0, %arg1 : i32
    %c0_i32 = arith.constant 0 : i32
    %c0_i32_0 = arith.constant 0 : i32
    return %1, %c0_i32 : i32, i32
  }
  func.func @transform_1(%arg0: i32, %arg1: i32) -> (i32, i32) {
    %c1_i32 = arith.constant 1 : i32
    %0 = arith.muli %arg0, %c1_i32 : i32
    %1 = arith.addi %0, %arg1 : i32
    %c0_i32 = arith.constant 0 : i32
    %c0_i32_0 = arith.constant 0 : i32
    return %1, %c0_i32 : i32, i32
  }
  func.func @transform_2(%arg0: i32, %arg1: i32) -> (i32, i32, i32) {
    %c0_i32 = arith.constant 0 : i32
    %c0_i32_0 = arith.constant 0 : i32
    %c0_i32_1 = arith.constant 0 : i32
    return %arg0, %c0_i32, %c0_i32_0 : i32, i32, i32
  }
}

</mosaic_0001>

<bundles_post_ra>
// kernel: tpu_custom_call.1
= control target key start
LH: loop header
LB: loop body
LE: loop exit
PB: predicated region body
PF: predicated region fallthrough
CT: control target
= control target key end

     0   :  { %7 = vsyncpa [#allocation4], 0  ;;  %s210_s0 = inlined_call_operand.hbm [shape: f32[16,128], index: 0, kind: input, shape index: {}]   ;;  %s211_s1 = inlined_call_operand.hbm [shape: f32[16,128], index: 1, kind: input, shape index: {}]   ;;  %s212_s2 = inlined_call_operand.hbm [shape: f32[1,1,1], index: 2, kind: output, shape index: {}]  }
   0x1   :  { %8 = vsyncpa [#allocation7], 0 }
   0x2   :  { %9 = vsyncpa [#allocation5], 0  ;;  %s181_s9 = smov [#allocation3]  }
   0x3   :  { %s19_s10 = sshll.u32 %s181_s9, 4  ;;  %s20_s10 = int_to_ptr.vmem [resolvable:$true] %s19_s10 }
   0x4   :  { %s123_s11 = scalar_lea.vmem %s20_s10, 256  ;;  %p128_p1 = scmp.lt.s32.totalorder %s20_s10, %s20_s10 }
   0x5   :  { %p124_p0 = scmp.ne.s32.totalorder %s20_s10, %s123_s11  ;;  %p129_p2 = scmp.lt.s32.totalorder %s123_s11, %s123_s11 }
   0x7   :  { %p130_p3 = por %p129_p2, %p128_p1 }
   0x9   :  { %p131_p4 = pnand %p130_p3, %p124_p0 }
   0xb   :  { %134 = shalt.err (!%p131_p4)
}
   0xc   :  { %s182_s12 = smov 128   ;;  %s183_s13 = smov 8  }
   0xd   :  { %25 = dma.hbm_to_vmem [thread:$0]  %s210_s0, 256, %s20_s10, [#allocation4], %s182_s12, %s182_s12, %s183_s13  }
   0xe   :  { %s184_s16 = smov [#allocation6]  }
   0xf   :  { %s35_s17 = sshll.u32 %s184_s16, 4  ;;  %s36_s17 = int_to_ptr.vmem [resolvable:$true] %s35_s17 }
  0x10   :  { %s143_s18 = scalar_lea.vmem %s36_s17, 256  ;;  %p148_p6 = scmp.lt.s32.totalorder %s36_s17, %s36_s17 }
  0x11   :  { %p144_p5 = scmp.ne.s32.totalorder %s36_s17, %s143_s18  ;;  %p149_p7 = scmp.lt.s32.totalorder %s143_s18, %s143_s18 }
  0x13   :  { %p150_p8 = por %p149_p7, %p148_p6 }
  0x15   :  { %p151_p9 = pnand %p150_p8, %p144_p5 }
  0x17   :  { %154 = shalt.err (!%p151_p9)
}
  0x18   :  { %41 = dma.hbm_to_vmem [thread:$0]  %s211_s1, 256, %s36_s17, [#allocation7], %s182_s12, %s182_s12, %s183_s13  }
  0x19   :  { %175 = dma.done.wait [#allocation4], 256  }
  0x1a   :  { %176 = vsyncadd [#allocation4], 4294967040 }
  0x1b   :  { %177 = dma.done.wait [#allocation7], 256  }
  0x1c   :  { %178 = vsyncadd [#allocation7], 4294967040  ;;  %v58_v0 = vld [vmem:[#allocation3] sm:$0xff]  ;;  %v59_v1 = vld [vmem:[#allocation3 + $0x8] sm:$0xff]  ;;  %s185_s0 = smov [#allocation8]   ;;  %vm90_vm0 = vcmask 0  }
  0x1d   :  { %v60_v2 = vld [vmem:[#allocation6] sm:$0xff]  ;;  %v61_v3 = vld [vmem:[#allocation6 + $0x8] sm:$0xff]  ;;  %s98_s1 = sshll.u32 %s185_s0, 4  ;;  %s99_s1 = int_to_ptr.vmem [resolvable:$true] %s98_s1 }
  0x1e   :  { %v62_v4 = vsub.f32 %v58_v0, %v60_v2  ;;  %v63_v5 = vsub.f32 %v59_v1, %v61_v3  ;;  %s155_s22 = scalar_lea.vmem %s99_s1, 16  ;;  %s159_s23 = scalar_lea.vmem %s99_s1, 32 }
  0x1f   :  { %p156_p10 = scmp.ne.s32.totalorder %s99_s1, %s155_s22  ;;  %p160_p11 = scmp.lt.s32.totalorder %s99_s1, %s99_s1 }
  0x20   :  { %v64_v6 = vmul.f32 %v62_v4, %v62_v4  ;;  %v65_v7 = vmul.f32 %v63_v5, %v63_v5  ;;  %p161_p12 = scmp.lt.s32.totalorder %s159_s23, %s155_s22 }
  0x22   :  { %v79_v8 = vadd.f32 %v65_v7, %v64_v6  ;;  %p162_p13 = por %p161_p12, %p160_p11 }
  0x24   :  { %80 = vadd.xlane.f32.xlu0 %v79_v8  ;;  %p163_p0 = pnand %p162_p13, %p156_p10 }
  0xad   :  { %v81_v9 = vpop.xlane.xlu0 %80 }
  0xae   :  { %v82_v10 = vrot.slane %v81_v9, 4 }
  0xb0   :  { %v83_v11 = vadd.f32 %v82_v10, %v81_v9 }
  0xb2   :  { %v84_v12 = vrot.slane %v83_v11, 2 }
  0xb4   :  { %v85_v13 = vadd.f32 %v84_v12, %v83_v11 }
  0xb6   :  { %v86_v14 = vrot.slane %v85_v13, 1 }
  0xb8   :  { %v87_v15 = vadd.f32 %v86_v14, %v85_v13 }
  0xba   :  { %108 = vpush %v87_v15 }
  0xeb   :  { %s109_s21 = spop %108 }
  0xec   :  { %v89_v16 = vstv %s109_s21 }
  0xed   :  { %91 = vst.msk [vmem:[#allocation8] sm:$0x1] %vm90_vm0, %v89_v16 }
  0xee   :  { %166 = shalt.err (!%p163_p0)
}
  0xef   :  { %101 = dma.vmem_to_hbm [thread:$0]  %s99_s1, 16, %s212_s2, [#allocation5]  }
  0xf0   :  { %179 = dma.done.wait [#allocation5], 16  }
  0xf1   :  { %180 = vsyncadd [#allocation5], 4294967280 }
  0xf2   :  { %105 = vsyncpa [#allocation4], 1 }
  0xf3   :  { %106 = vsyncpa [#allocation7], 1 }
  0xf4   :  { %107 = vsyncpa [#allocation5], 1 }

</bundles_post_ra>
